<compile_context>
chip_gen: v7x
topology: tpu7x:2x2x1
jax: 0.10.0
libtpu: 0.0.40
codegen_flags: <defaults>
</compile_context>

<pallas_src>
import functools

import jax
import jax.numpy as jnp
from jax.experimental import pallas as pl
from jax.experimental.pallas import tpu as pltpu


# ---------------------------------------------------------------------------
# Kernels
# ---------------------------------------------------------------------------
def lstm_fused_kernel(x_ref, we_ref, be_ref, wih_ref, bg_ref,
                      wo_ref, bo_ref, gamma_ref, beta_ref, out_ref,
                      *, hidden_size, n_layers, eps):
    """Single grid step: embed -> statically-unrolled layer loop -> output head.

    Weights are fully VMEM-resident; h is carried in bf16 across layers, gate
    math stays fp32. Gate columns are pre-pruned to [input, cell, output]
    (forget gate is dead because c_prev == 0).
    """
    H = hidden_size

    # --- embed Linear(input_size, hidden_size) ---
    h = (jnp.dot(x_ref[...].astype(jnp.bfloat16), we_ref[...],
                 preferred_element_type=jnp.float32) + be_ref[...])
    h = h.astype(jnp.bfloat16)

    # --- n_layers x nn.LSTMCell(H, H) with zero-initialized (h, c):
    #     h_prev @ W_hh == 0 and f_g * c_prev == 0 are dropped exactly.
    for l in range(n_layers):
        gates = (jnp.dot(h, wih_ref[l], preferred_element_type=jnp.float32)
                 + bg_ref[l])
        i_g = jax.nn.sigmoid(gates[:, 0 * H:1 * H])   # input gate
        g_g = jnp.tanh(gates[:, 1 * H:2 * H])         # cell candidate
        o_g = jax.nn.sigmoid(gates[:, 2 * H:3 * H])   # output gate
        c_new = i_g * g_g
        h = (o_g * jnp.tanh(c_new)).astype(jnp.bfloat16)

    # --- Linear -> BatchNorm1d (training-mode stats over the full batch) -> Tanh
    y = (jnp.dot(h, wo_ref[...], preferred_element_type=jnp.float32)
         + bo_ref[...])
    mean = jnp.mean(y, axis=0, keepdims=True)
    var = jnp.mean((y - mean) ** 2, axis=0, keepdims=True)
    y_hat = (y - mean) * jax.lax.rsqrt(var + eps)
    out_ref[...] = jnp.tanh(gamma_ref[...] * y_hat + beta_ref[...])


def lstm_streamed_kernel(x_ref, we_ref, be_ref, wih_ref, bg_ref,
                         wo_ref, bo_ref, gamma_ref, beta_ref, out_ref,
                         h_scratch, *, hidden_size, eps):
    """Fallback for large configs: one grid step per layer, W_ih streamed."""
    H = hidden_size
    l = pl.program_id(0)
    n_layers = pl.num_programs(0)

    @pl.when(l == 0)
    def _():
        h0 = (jnp.dot(x_ref[...].astype(jnp.bfloat16), we_ref[...],
                      preferred_element_type=jnp.float32) + be_ref[...])
        h_scratch[...] = h0.astype(jnp.bfloat16)

    gates = (jnp.dot(h_scratch[...], wih_ref[...],
                     preferred_element_type=jnp.float32) + bg_ref[...])
    i_g = jax.nn.sigmoid(gates[:, 0 * H:1 * H])
    g_g = jnp.tanh(gates[:, 1 * H:2 * H])
    o_g = jax.nn.sigmoid(gates[:, 2 * H:3 * H])
    c_new = i_g * g_g
    h_scratch[...] = (o_g * jnp.tanh(c_new)).astype(jnp.bfloat16)

    @pl.when(l == n_layers - 1)
    def _():
        y = (jnp.dot(h_scratch[...], wo_ref[...],
                     preferred_element_type=jnp.float32) + bo_ref[...])
        mean = jnp.mean(y, axis=0, keepdims=True)
        var = jnp.mean((y - mean) ** 2, axis=0, keepdims=True)
        y_hat = (y - mean) * jax.lax.rsqrt(var + eps)
        out_ref[...] = jnp.tanh(gamma_ref[...] * y_hat + beta_ref[...])


# ---------------------------------------------------------------------------
# Wrapper
# ---------------------------------------------------------------------------
def _prune_forget_gate(w4, H):
    """Keep the input (0:H), cell (2H:3H), output (3H:4H) gate columns."""
    return jnp.concatenate(
        [w4[..., 0 * H:1 * H], w4[..., 2 * H:3 * H], w4[..., 3 * H:4 * H]],
        axis=-1)


def make_params(key, input_size, hidden_size, output_size, n_layers):
    """Mirror of the torch module's parameters (weights pre-transposed to x @ W)."""
    ks = jax.random.split(key, 10)
    scale = 0.1
    we = scale * jax.random.normal(ks[0], (input_size, hidden_size), jnp.float32)
    be = scale * jax.random.normal(ks[1], (1, hidden_size), jnp.float32)
    wih = scale * jax.random.normal(ks[2], (n_layers, hidden_size, 4 * hidden_size), jnp.float32)
    whh = scale * jax.random.normal(ks[3], (n_layers, hidden_size, 4 * hidden_size), jnp.float32)
    bih = scale * jax.random.normal(ks[4], (n_layers, 1, 4 * hidden_size), jnp.float32)
    bhh = scale * jax.random.normal(ks[5], (n_layers, 1, 4 * hidden_size), jnp.float32)
    wo = scale * jax.random.normal(ks[6], (hidden_size, output_size), jnp.float32)
    bo = scale * jax.random.normal(ks[7], (1, output_size), jnp.float32)
    gamma = 1.0 + scale * jax.random.normal(ks[8], (1, output_size), jnp.float32)
    beta = scale * jax.random.normal(ks[9], (1, output_size), jnp.float32)
    return (we, be, wih, whh, bih, bhh, wo, bo, gamma, beta)


def lstm_forward(x, params, *, hidden_size, output_size, n_layers, eps=1e-5):
    we, be, wih, whh, bih, bhh, wo, bo, gamma, beta = params
    del whh  # multiplies the zero-initialized hidden state -> exact no-op
    B, In = x.shape
    H = hidden_size
    Out = output_size

    # bf16 MXU operands; fp32 biases / gate math. Pre-sum gate biases and prune
    # the dead forget-gate columns (c_prev == 0) -> 3H-wide gate matmuls.
    we_b = we.astype(jnp.bfloat16)
    wo_b = wo.astype(jnp.bfloat16)
    wih_b = _prune_forget_gate(wih, H).astype(jnp.bfloat16)           # (L, H, 3H)
    bg = _prune_forget_gate((bih + bhh).astype(jnp.float32), H)       # (L, 1, 3H)

    flops = (2 * B * In * H
             + n_layers * 2 * B * H * (3 * H)
             + 2 * B * H * Out)
    transcendentals = n_layers * 4 * B * H + B * Out
    bytes_accessed = (x.size * 4 + we_b.size * 2 + be.size * 4
                      + wih_b.size * 2 + bg.size * 4
                      + wo_b.size * 2 + (bo.size + gamma.size + beta.size) * 4
                      + B * Out * 4)
    cost = pl.CostEstimate(flops=flops, transcendentals=transcendentals,
                           bytes_accessed=bytes_accessed)

    # VMEM footprint bookkeeping (bytes).
    small_bytes = (x.size * 4 + we_b.size * 2 + be.size * 4
                   + wo_b.size * 2 + (bo.size + gamma.size + beta.size) * 4
                   + B * Out * 4 + B * H * 4)
    weight_block_bytes = wih_b.size * 2 + bg.size * 4        # all layers resident
    per_layer_bytes = H * 3 * H * 2 + 3 * H * 4              # one streamed layer

    # Resident-vs-streamed gate: conservative threshold of ~half the v7x scoped
    # VMEM default (32 MiB). v5e/v6e (128 MiB physical) could go 2x looser, but
    # the conservative bound keeps the fast path portable across generations.
    RESIDENT_LIMIT_BYTES = 16 * 1024 * 1024
    use_resident = (small_bytes + weight_block_bytes) <= RESIDENT_LIMIT_BYTES

    if use_resident:
        # Single grid step, statically unrolled layer loop, all weights in VMEM.
        vmem_limit = min(max(4 * (small_bytes + weight_block_bytes),
                             4 * 1024 * 1024),
                         64 * 1024 * 1024)
        kernel = functools.partial(lstm_fused_kernel, hidden_size=H,
                                   n_layers=n_layers, eps=eps)
        vmem_spec = pl.BlockSpec(memory_space=pltpu.MemorySpace.VMEM)
        return pl.pallas_call(
            kernel,
            out_shape=jax.ShapeDtypeStruct((B, Out), jnp.float32),
            in_specs=[vmem_spec] * 9,
            out_specs=vmem_spec,
            compiler_params=pltpu.CompilerParams(vmem_limit_bytes=vmem_limit),
            cost_estimate=cost,
        )(x, we_b, be, wih_b, bg, wo_b, bo, gamma, beta)

    # Fallback for large H / n_layers: stream W_ih per layer (auto double-buffered).
    vmem_limit = min(max(4 * (small_bytes + 2 * per_layer_bytes),
                         4 * 1024 * 1024),
                     64 * 1024 * 1024)
    kernel = functools.partial(lstm_streamed_kernel, hidden_size=H, eps=eps)
    grid_spec = pltpu.PrefetchScalarGridSpec(
        num_scalar_prefetch=0,
        grid=(n_layers,),
        in_specs=[
            pl.BlockSpec((B, In), lambda l: (0, 0)),                 # x
            pl.BlockSpec((In, H), lambda l: (0, 0)),                 # W_embed (bf16)
            pl.BlockSpec((1, H), lambda l: (0, 0)),                  # b_embed
            pl.BlockSpec((None, H, 3 * H), lambda l: (l, 0, 0)),     # W_ih[l] (pruned, streamed)
            pl.BlockSpec((None, 1, 3 * H), lambda l: (l, 0, 0)),     # bih[l]+bhh[l] (pruned)
            pl.BlockSpec((H, Out), lambda l: (0, 0)),                # W_out (bf16)
            pl.BlockSpec((1, Out), lambda l: (0, 0)),                # b_out
            pl.BlockSpec((1, Out), lambda l: (0, 0)),                # bn gamma
            pl.BlockSpec((1, Out), lambda l: (0, 0)),                # bn beta
        ],
        out_specs=pl.BlockSpec((B, Out), lambda l: (0, 0)),
        scratch_shapes=[pltpu.VMEM((B, H), jnp.bfloat16)],           # h carry (bf16)
    )
    return pl.pallas_call(
        kernel,
        out_shape=jax.ShapeDtypeStruct((B, Out), jnp.float32),
        grid_spec=grid_spec,
        compiler_params=pltpu.CompilerParams(
            dimension_semantics=("arbitrary",),
            vmem_limit_bytes=vmem_limit),
        cost_estimate=cost,
    )(x, we_b, be, wih_b, bg, wo_b, bo, gamma, beta)


# ---------------------------------------------------------------------------
# Pure-JAX reference (full torch math incl. W_hh / forget gate)
# ---------------------------------------------------------------------------
def lstm_forward_ref(x, params, *, hidden_size, n_layers, eps=1e-5):
    we, be, wih, whh, bih, bhh, wo, bo, gamma, beta = params
    B = x.shape[0]
    H = hidden_size

    def mm(a, w):
        return jnp.dot(a.astype(jnp.bfloat16), w.astype(jnp.bfloat16),
                       preferred_element_type=jnp.float32)

    h_in = mm(x, we) + be
    for l in range(n_layers):
        h_prev = jnp.zeros((B, H), jnp.float32)
        c_prev = jnp.zeros((B, H), jnp.float32)
        gates = mm(h_in, wih[l]) + mm(h_prev, whh[l]) + bih[l] + bhh[l]
        i_g = jax.nn.sigmoid(gates[:, 0 * H:1 * H])
        f_g = jax.nn.sigmoid(gates[:, 1 * H:2 * H])
        g_g = jnp.tanh(gates[:, 2 * H:3 * H])
        o_g = jax.nn.sigmoid(gates[:, 3 * H:4 * H])
        c_new = f_g * c_prev + i_g * g_g
        h_in = o_g * jnp.tanh(c_new)
    y = mm(h_in, wo) + bo
    mean = jnp.mean(y, axis=0, keepdims=True)
    var = jnp.mean((y - mean) ** 2, axis=0, keepdims=True)
    return jnp.tanh(gamma * (y - mean) / jnp.sqrt(var + eps) + beta)


if __name__ == "__main__":
    # Small shapes consistent with the module's forward (2D input: (batch, input_size)).
    # hidden_size is lane-aligned (128) so each gate slice is a full 128-lane span.
    # (Throughput note: at B=8 the matmuls are latency-bound; aggregate samples
    #  into batches of 128/256 when the caller allows.)
    batch_size = 8
    input_size = 16
    hidden_size = 128
    output_size = 8
    n_layers = 3

    key = jax.random.PRNGKey(0)
    k_x, k_p = jax.random.split(key)
    x = jax.random.normal(k_x, (batch_size, input_size), jnp.float32)
    params = make_params(k_p, input_size, hidden_size, output_size, n_layers)

    out = lstm_forward(x, params,
                       hidden_size=hidden_size,
                       output_size=output_size,
                       n_layers=n_layers)
    out = jax.block_until_ready(out)

    ref = lstm_forward_ref(x, params, hidden_size=hidden_size, n_layers=n_layers)
    assert out.shape == (batch_size, output_size)
    assert jnp.allclose(out, ref, atol=5e-3, rtol=5e-3), "Pallas kernel mismatch vs reference"

    print("KERNEL_OK")
</pallas_src>

<mosaic_0001>
module attributes {stable_mosaic.version = 11 : i64} {
  func.func @lstm_fused_kernel(%arg0: memref<8x16xf32, #tpu.memory_space<vmem>>, %arg1: memref<16x128xbf16, #tpu.memory_space<vmem>>, %arg2: memref<1x128xf32, #tpu.memory_space<vmem>>, %arg3: memref<3x128x384xbf16, #tpu.memory_space<vmem>>, %arg4: memref<3x1x384xf32, #tpu.memory_space<vmem>>, %arg5: memref<128x8xbf16, #tpu.memory_space<vmem>>, %arg6: memref<1x8xf32, #tpu.memory_space<vmem>>, %arg7: memref<1x8xf32, #tpu.memory_space<vmem>>, %arg8: memref<1x8xf32, #tpu.memory_space<vmem>>, %arg9: memref<8x8xf32, #tpu.memory_space<vmem>>) attributes {dimension_semantics = [], scalar_prefetch = 0 : i64, scratch_operands = 0 : i64, tpu.core_type = #tpu.core_type<tc>} {
    %c0 = arith.constant 0 : index
    %c0_0 = arith.constant 0 : index
    %0 = vector.load %arg0[%c0, %c0_0] : memref<8x16xf32, #tpu.memory_space<vmem>>, vector<8x16xf32>
    %1 = arith.truncf %0 : vector<8x16xf32> to vector<8x16xbf16>
    %c0_1 = arith.constant 0 : index
    %c0_2 = arith.constant 0 : index
    %2 = vector.load %arg1[%c0_1, %c0_2] : memref<16x128xbf16, #tpu.memory_space<vmem>>, vector<16x128xbf16>
    %cst = arith.constant dense<0.000000e+00> : vector<8x128xf32>
    %3 = tpu.matmul %1, %2, %cst {dimension_numbers = #tpu.dot_dimension_numbers<[1], [0], [0], [1], [0, 0, 1, 1], [], []>} : vector<8x16xbf16>, vector<16x128xbf16>, vector<8x128xf32> -> vector<8x128xf32>
    %c0_3 = arith.constant 0 : index
    %c0_4 = arith.constant 0 : index
    %4 = vector.load %arg2[%c0_3, %c0_4] : memref<1x128xf32, #tpu.memory_space<vmem>>, vector<1x128xf32>
    %5 = vector.broadcast %4 : vector<1x128xf32> to vector<8x128xf32>
    %6 = arith.addf %3, %5 : vector<8x128xf32>
    %7 = arith.truncf %6 : vector<8x128xf32> to vector<8x128xbf16>
    %c0_5 = arith.constant 0 : index
    %c0_6 = arith.constant 0 : index
    %c0_7 = arith.constant 0 : index
    %8 = vector.load %arg3[%c0_5, %c0_6, %c0_7] : memref<3x128x384xbf16, #tpu.memory_space<vmem>>, vector<1x128x384xbf16>
    %9 = vector.shape_cast %8 : vector<1x128x384xbf16> to vector<128x384xbf16>
    %cst_8 = arith.constant dense<0.000000e+00> : vector<8x384xf32>
    %10 = tpu.matmul %7, %9, %cst_8 {dimension_numbers = #tpu.dot_dimension_numbers<[1], [0], [0], [1], [0, 0, 1, 1], [], []>} : vector<8x128xbf16>, vector<128x384xbf16>, vector<8x384xf32> -> vector<8x384xf32>
    %c0_9 = arith.constant 0 : index
    %c0_10 = arith.constant 0 : index
    %c0_11 = arith.constant 0 : index
    %11 = vector.load %arg4[%c0_9, %c0_10, %c0_11] : memref<3x1x384xf32, #tpu.memory_space<vmem>>, vector<1x1x384xf32>
    %12 = vector.shape_cast %11 : vector<1x1x384xf32> to vector<1x384xf32>
    %13 = vector.broadcast %12 : vector<1x384xf32> to vector<8x384xf32>
    %14 = arith.addf %10, %13 : vector<8x384xf32>
    %15 = vector.extract_strided_slice %14 {offsets = [0, 0], sizes = [8, 128], strides = [1, 1]} : vector<8x384xf32> to vector<8x128xf32>
    %16 = arith.negf %15 : vector<8x128xf32>
    %17 = math.exp %16 : vector<8x128xf32>
    %cst_12 = arith.constant 1.000000e+00 : f32
    %18 = vector.broadcast %cst_12 : f32 to vector<8x128xf32>
    %19 = arith.addf %18, %17 : vector<8x128xf32>
    %20 = arith.divf %18, %19 : vector<8x128xf32>
    %21 = vector.extract_strided_slice %14 {offsets = [0, 128], sizes = [8, 128], strides = [1, 1]} : vector<8x384xf32> to vector<8x128xf32>
    %22 = math.tanh %21 : vector<8x128xf32>
    %23 = vector.extract_strided_slice %14 {offsets = [0, 256], sizes = [8, 128], strides = [1, 1]} : vector<8x384xf32> to vector<8x128xf32>
    %24 = arith.negf %23 : vector<8x128xf32>
    %25 = math.exp %24 : vector<8x128xf32>
    %cst_13 = arith.constant 1.000000e+00 : f32
    %26 = vector.broadcast %cst_13 : f32 to vector<8x128xf32>
    %27 = arith.addf %26, %25 : vector<8x128xf32>
    %28 = arith.divf %26, %27 : vector<8x128xf32>
    %29 = arith.mulf %20, %22 : vector<8x128xf32>
    %30 = math.tanh %29 : vector<8x128xf32>
    %31 = arith.mulf %28, %30 : vector<8x128xf32>
    %32 = arith.truncf %31 : vector<8x128xf32> to vector<8x128xbf16>
    %c1 = arith.constant 1 : index
    %c0_14 = arith.constant 0 : index
    %c0_15 = arith.constant 0 : index
    %33 = vector.load %arg3[%c1, %c0_14, %c0_15] : memref<3x128x384xbf16, #tpu.memory_space<vmem>>, vector<1x128x384xbf16>
    %34 = vector.shape_cast %33 : vector<1x128x384xbf16> to vector<128x384xbf16>
    %cst_16 = arith.constant dense<0.000000e+00> : vector<8x384xf32>
    %35 = tpu.matmul %32, %34, %cst_16 {dimension_numbers = #tpu.dot_dimension_numbers<[1], [0], [0], [1], [0, 0, 1, 1], [], []>} : vector<8x128xbf16>, vector<128x384xbf16>, vector<8x384xf32> -> vector<8x384xf32>
    %c1_17 = arith.constant 1 : index
    %c0_18 = arith.constant 0 : index
    %c0_19 = arith.constant 0 : index
    %36 = vector.load %arg4[%c1_17, %c0_18, %c0_19] : memref<3x1x384xf32, #tpu.memory_space<vmem>>, vector<1x1x384xf32>
    %37 = vector.shape_cast %36 : vector<1x1x384xf32> to vector<1x384xf32>
    %38 = vector.broadcast %37 : vector<1x384xf32> to vector<8x384xf32>
    %39 = arith.addf %35, %38 : vector<8x384xf32>
    %40 = vector.extract_strided_slice %39 {offsets = [0, 0], sizes = [8, 128], strides = [1, 1]} : vector<8x384xf32> to vector<8x128xf32>
    %41 = arith.negf %40 : vector<8x128xf32>
    %42 = math.exp %41 : vector<8x128xf32>
    %cst_20 = arith.constant 1.000000e+00 : f32
    %43 = vector.broadcast %cst_20 : f32 to vector<8x128xf32>
    %44 = arith.addf %43, %42 : vector<8x128xf32>
    %45 = arith.divf %43, %44 : vector<8x128xf32>
    %46 = vector.extract_strided_slice %39 {offsets = [0, 128], sizes = [8, 128], strides = [1, 1]} : vector<8x384xf32> to vector<8x128xf32>
    %47 = math.tanh %46 : vector<8x128xf32>
    %48 = vector.extract_strided_slice %39 {offsets = [0, 256], sizes = [8, 128], strides = [1, 1]} : vector<8x384xf32> to vector<8x128xf32>
    %49 = arith.negf %48 : vector<8x128xf32>
    %50 = math.exp %49 : vector<8x128xf32>
    %cst_21 = arith.constant 1.000000e+00 : f32
    %51 = vector.broadcast %cst_21 : f32 to vector<8x128xf32>
    %52 = arith.addf %51, %50 : vector<8x128xf32>
    %53 = arith.divf %51, %52 : vector<8x128xf32>
    %54 = arith.mulf %45, %47 : vector<8x128xf32>
    %55 = math.tanh %54 : vector<8x128xf32>
    %56 = arith.mulf %53, %55 : vector<8x128xf32>
    %57 = arith.truncf %56 : vector<8x128xf32> to vector<8x128xbf16>
    %c2 = arith.constant 2 : index
    %c0_22 = arith.constant 0 : index
    %c0_23 = arith.constant 0 : index
    %58 = vector.load %arg3[%c2, %c0_22, %c0_23] : memref<3x128x384xbf16, #tpu.memory_space<vmem>>, vector<1x128x384xbf16>
    %59 = vector.shape_cast %58 : vector<1x128x384xbf16> to vector<128x384xbf16>
    %cst_24 = arith.constant dense<0.000000e+00> : vector<8x384xf32>
    %60 = tpu.matmul %57, %59, %cst_24 {dimension_numbers = #tpu.dot_dimension_numbers<[1], [0], [0], [1], [0, 0, 1, 1], [], []>} : vector<8x128xbf16>, vector<128x384xbf16>, vector<8x384xf32> -> vector<8x384xf32>
    %c2_25 = arith.constant 2 : index
    %c0_26 = arith.constant 0 : index
    %c0_27 = arith.constant 0 : index
    %61 = vector.load %arg4[%c2_25, %c0_26, %c0_27] : memref<3x1x384xf32, #tpu.memory_space<vmem>>, vector<1x1x384xf32>
    %62 = vector.shape_cast %61 : vector<1x1x384xf32> to vector<1x384xf32>
    %63 = vector.broadcast %62 : vector<1x384xf32> to vector<8x384xf32>
    %64 = arith.addf %60, %63 : vector<8x384xf32>
    %65 = vector.extract_strided_slice %64 {offsets = [0, 0], sizes = [8, 128], strides = [1, 1]} : vector<8x384xf32> to vector<8x128xf32>
    %66 = arith.negf %65 : vector<8x128xf32>
    %67 = math.exp %66 : vector<8x128xf32>
    %cst_28 = arith.constant 1.000000e+00 : f32
    %68 = vector.broadcast %cst_28 : f32 to vector<8x128xf32>
    %69 = arith.addf %68, %67 : vector<8x128xf32>
    %70 = arith.divf %68, %69 : vector<8x128xf32>
    %71 = vector.extract_strided_slice %64 {offsets = [0, 128], sizes = [8, 128], strides = [1, 1]} : vector<8x384xf32> to vector<8x128xf32>
    %72 = math.tanh %71 : vector<8x128xf32>
    %73 = vector.extract_strided_slice %64 {offsets = [0, 256], sizes = [8, 128], strides = [1, 1]} : vector<8x384xf32> to vector<8x128xf32>
    %74 = arith.negf %73 : vector<8x128xf32>
    %75 = math.exp %74 : vector<8x128xf32>
    %cst_29 = arith.constant 1.000000e+00 : f32
    %76 = vector.broadcast %cst_29 : f32 to vector<8x128xf32>
    %77 = arith.addf %76, %75 : vector<8x128xf32>
    %78 = arith.divf %76, %77 : vector<8x128xf32>
    %79 = arith.mulf %70, %72 : vector<8x128xf32>
    %80 = math.tanh %79 : vector<8x128xf32>
    %81 = arith.mulf %78, %80 : vector<8x128xf32>
    %82 = arith.truncf %81 : vector<8x128xf32> to vector<8x128xbf16>
    %c0_30 = arith.constant 0 : index
    %c0_31 = arith.constant 0 : index
    %83 = vector.load %arg5[%c0_30, %c0_31] : memref<128x8xbf16, #tpu.memory_space<vmem>>, vector<128x8xbf16>
    %cst_32 = arith.constant dense<0.000000e+00> : vector<8x8xf32>
    %84 = tpu.matmul %82, %83, %cst_32 {dimension_numbers = #tpu.dot_dimension_numbers<[1], [0], [0], [1], [0, 0, 1, 1], [], []>} : vector<8x128xbf16>, vector<128x8xbf16>, vector<8x8xf32> -> vector<8x8xf32>
    %c0_33 = arith.constant 0 : index
    %c0_34 = arith.constant 0 : index
    %85 = vector.load %arg6[%c0_33, %c0_34] : memref<1x8xf32, #tpu.memory_space<vmem>>, vector<1x8xf32>
    %86 = vector.broadcast %85 : vector<1x8xf32> to vector<8x8xf32>
    %87 = arith.addf %84, %86 : vector<8x8xf32>
    %cst_35 = arith.constant dense<0.000000e+00> : vector<8xf32>
    %88 = vector.multi_reduction <add>, %87, %cst_35 [0] : vector<8x8xf32> to vector<8xf32>
    %89 = vector.shape_cast %88 : vector<8xf32> to vector<1x8xf32>
    %cst_36 = arith.constant 8.000000e+00 : f32
    %90 = vector.broadcast %cst_36 : f32 to vector<1x8xf32>
    %91 = arith.divf %89, %90 : vector<1x8xf32>
    %92 = vector.broadcast %91 : vector<1x8xf32> to vector<8x8xf32>
    %93 = arith.subf %87, %92 : vector<8x8xf32>
    %94 = arith.mulf %93, %93 : vector<8x8xf32>
    %cst_37 = arith.constant dense<0.000000e+00> : vector<8xf32>
    %95 = vector.multi_reduction <add>, %94, %cst_37 [0] : vector<8x8xf32> to vector<8xf32>
    %96 = vector.shape_cast %95 : vector<8xf32> to vector<1x8xf32>
    %cst_38 = arith.constant 8.000000e+00 : f32
    %97 = vector.broadcast %cst_38 : f32 to vector<1x8xf32>
    %98 = arith.divf %96, %97 : vector<1x8xf32>
    %99 = vector.broadcast %91 : vector<1x8xf32> to vector<8x8xf32>
    %100 = arith.subf %87, %99 : vector<8x8xf32>
    %cst_39 = arith.constant 9.99999974E-6 : f32
    %101 = vector.broadcast %cst_39 : f32 to vector<1x8xf32>
    %102 = arith.addf %98, %101 : vector<1x8xf32>
    %103 = math.rsqrt %102 : vector<1x8xf32>
    %104 = vector.broadcast %103 : vector<1x8xf32> to vector<8x8xf32>
    %105 = arith.mulf %100, %104 : vector<8x8xf32>
    %c0_40 = arith.constant 0 : index
    %c0_41 = arith.constant 0 : index
    %106 = vector.load %arg7[%c0_40, %c0_41] : memref<1x8xf32, #tpu.memory_space<vmem>>, vector<1x8xf32>
    %107 = vector.broadcast %106 : vector<1x8xf32> to vector<8x8xf32>
    %108 = arith.mulf %107, %105 : vector<8x8xf32>
    %c0_42 = arith.constant 0 : index
    %c0_43 = arith.constant 0 : index
    %109 = vector.load %arg8[%c0_42, %c0_43] : memref<1x8xf32, #tpu.memory_space<vmem>>, vector<1x8xf32>
    %110 = vector.broadcast %109 : vector<1x8xf32> to vector<8x8xf32>
    %111 = arith.addf %108, %110 : vector<8x8xf32>
    %112 = math.tanh %111 : vector<8x8xf32>
    %c0_44 = arith.constant 0 : index
    %c0_45 = arith.constant 0 : index
    %113 = vector.load %arg9[%c0_44, %c0_45] : memref<8x8xf32, #tpu.memory_space<vmem>>, vector<8x8xf32>
    tpu.vector_store %arg9[%c0_44, %c0_45], %112 {strides = array<i32>} : memref<8x8xf32, #tpu.memory_space<vmem>>, vector<8x8xf32>,
    return
  }
}

</mosaic_0001>

<bundles_post_ra>
// kernel: tpu_custom_call.1
= control target key start
LH: loop header
LB: loop body
LE: loop exit
PB: predicated region body
PF: predicated region fallthrough
CT: control target
= control target key end

     0   :  { %14 = vsyncpa [#allocation3], 0  ;;  %s1720_s0 = inlined_call_operand.vmem [shape: f32[8,16], index: 0, kind: input, shape index: {}]   ;;  %s1721_s1 = inlined_call_operand.vmem [shape: bf16[16,128], index: 1, kind: input, shape index: {}]   ;;  %s1722_s2 = inlined_call_operand.vmem [shape: f32[1,128], index: 2, kind: input, shape index: {}]   ;;  %s1723_s3 = inlined_call_operand.hbm [shape: bf16[3,128,384], index: 3, kind: input, shape index: {}]   ;;  %s1724_s4 = inlined_call_operand.vmem [shape: f32[3,1,384], index: 4, kind: input, shape index: {}]   ;;  %s1725_s5 = inlined_call_operand.vmem [shape: bf16[128,8], index: 5, kind: input, shape index: {}]   ;;  %s1726_s6 = inlined_call_operand.vmem [shape: f32[1,8], index: 6, kind: input, shape index: {}]   ;;  %s1727_s7 = inlined_call_operand.vmem [shape: f32[1,8], index: 7, kind: input, shape index: {}]   ;;  %s1728_s8 = inlined_call_operand.vmem [shape: f32[1,8], index: 8, kind: input, shape index: {}]   ;;  %s1729_s9 = inlined_call_operand.hbm [shape: f32[8,8], index: 9, kind: output, shape index: {}]  }
   0x1   :  { %15 = vsyncpa [#allocation4], 0  ;;  %s1524_s30 = smov [#allocation2]   ;;  %s1476_s13 = scalar_lea.hbm %s1723_s3, 9216 }
   0x2   :  { %s27_s10 = sshll.u32 %s1524_s30, 4  ;;  %p1477_p0 = scmp.ne.s32.totalorder %s1723_s3, %s1476_s13  ;;  %s28_s10 = int_to_ptr.vmem [resolvable:$true] %s27_s10 }
   0x3   :  { %p1480_p1 = scmp.lt.u32.totalorder %s1476_s13, %s1723_s3 }
   0x5   :  { %p1482_p2 = pnand %p1480_p1, %p1477_p0 }
   0x7   :  { %1485 = shalt.err (!%p1482_p2)
}
   0x8   :  { %s1486_s18 = scalar_lea.vmem %s28_s10, 9216  ;;  %p1491_p4 = scmp.lt.s32.totalorder %s28_s10, %s28_s10 }
   0x9   :  { %p1487_p3 = scmp.ne.s32.totalorder %s28_s10, %s1486_s18  ;;  %p1492_p5 = scmp.lt.s32.totalorder %s1486_s18, %s1486_s18 }
   0xb   :  { %p1493_p6 = por %p1492_p5, %p1491_p4 }
   0xd   :  { %p1494_p7 = pnand %p1493_p6, %p1487_p3 }
   0xf   :  { %1497 = shalt.err (!%p1494_p7)
}
  0x10   :  { %s1525_s19 = smov 192   ;;  %s1526_s20 = smov 12  }
  0x11   :  { %33 = dma.hbm_to_vmem [thread:$0]  %s1723_s3, 9216, %s28_s10, [#allocation3], %s1525_s19, %s1525_s19, %s1526_s20  }
  0x12   :  { %1520 = dma.done.wait [#allocation3], 9216  }
  0x13   :  { %1521 = vsyncadd [#allocation3], 4294958080  ;;  %v1527_v0 = vmov 0.0   ;;  %vm1528_vm0 = vmmov 0   ;;  %v1331_v1 = vld [vmem:[%s1721_s1] sm:$0xff]   ;;  %vm65_vm1 = vcmask 130048   ;;  %v144_v60 = vlaneseq }
  0x14   :  { %1238 = vmatprep.subr.bf16.mxu0 %v1527_v0  ;;  %1240 = vmatprep.mubr.msk.bf16.mxu0 %vm1528_vm0, %v1527_v0  ;;  %v48_v2 = vld [vmem:[%s1720_s0] sm:$0xff]  ;;  %v1335_v6 = vld [vmem:[#allocation2 + $0x8] ss:$12 sps:$4 sm:$0xff]   ;;  %v1342_v11 = vld [vmem:[#allocation2 + $0x30] ss:$12 sps:$4 sm:$0xff]   ;;  %v1529_v28 = vmov 0  }
  0x15   :  { %1239 = vmatpush3.bf16.msra.mxu0 %v1331_v1  ;;  %v49_v3 = vpack.c.bf16 %v48_v2, %v48_v2  ;;  %v1332_v4 = vld [vmem:[#allocation2 + $0x4] ss:$12 sps:$4 sm:$0xff]   ;;  %v1334_v5 = vld [vmem:[#allocation2] ss:$12 sps:$4 sm:$0xff]   ;;  %v1336_v7 = vld [vmem:[#allocation2 + $0x1c] ss:$12 sps:$4 sm:$0xff]   ;;  %319 = vmatprep.mubr.bf16.mxu1 %v1529_v28 }
  0x16   :  { %1244 = vmatprep.subr.bf16.mxu0 %v1527_v0  ;;  %287 = vmatprep.subr.bf16.mxu1 %v1332_v4  ;;  %v1338_v8 = vld [vmem:[#allocation2 + $0x18] ss:$12 sps:$4 sm:$0xff]   ;;  %v1339_v9 = vld [vmem:[#allocation2 + $0x20] ss:$12 sps:$4 sm:$0xff]   ;;  %v1346_v14 = vld [vmem:[#allocation2 + $0x48] ss:$12 sps:$4 sm:$0xff]  }
  0x17   :  { %288 = vmatpush1.bf16.msra.mxu1 %v1334_v5  ;;  %v1340_v10 = vld [vmem:[#allocation2 + $0x34] ss:$12 sps:$4 sm:$0xff]   ;;  %v1343_v12 = vld [vmem:[#allocation2 + $0x38] ss:$12 sps:$4 sm:$0xff]   ;;  %v1347_v15 = vld [vmem:[#allocation2 + $0x50] ss:$12 sps:$4 sm:$0xff]  }
  0x18   :  { %1241 = vmatmul.mubr.msk.bf16.vlgmr.msra.gmra.mrb[0].mxu0 %vm65_vm1, %v49_v3  ;;  %289 = vmatprep.subr.bf16.mxu1 %v1336_v7  ;;  %v1344_v13 = vld [vmem:[#allocation2 + $0x4c] ss:$12 sps:$4 sm:$0xff]   ;;  %v1348_v16 = vld [vmem:[#allocation2 + $0x64] ss:$12 sps:$4 sm:$0xff]   ;;  %v1351_v18 = vld [vmem:[#allocation2 + $0x68] ss:$12 sps:$4 sm:$0xff]  }
  0x19   :  { %1245 = vmatpush3.bf16.msra.mxu0 %v1335_v6  ;;  %1260 = vmatprep.mubr.msk.bf16.mxu0 %vm1528_vm0, %v1527_v0  ;;  %v1350_v17 = vld [vmem:[#allocation2 + $0x60] ss:$12 sps:$4 sm:$0xff]   ;;  %v1352_v19 = vld [vmem:[#allocation2 + $0x7c] ss:$12 sps:$4 sm:$0xff]   ;;  %v1354_v20 = vld [vmem:[#allocation2 + $0x78] ss:$12 sps:$4 sm:$0xff]  }
  0x1a   :  { %1246 = vmatprep.subr.bf16.mxu0 %v1527_v0  ;;  %v1355_v21 = vld [vmem:[#allocation2 + $0x80] ss:$12 sps:$4 sm:$0xff]   ;;  %v1358_v23 = vld [vmem:[#allocation2 + $0x90] ss:$12 sps:$4 sm:$0xff]   ;;  %v1359_v24 = vld [vmem:[#allocation2 + $0x98] ss:$12 sps:$4 sm:$0xff]  }
  0x1b   :  { %290 = vmatpush1.bf16.msra.mxu1 %v1338_v8  ;;  %v1356_v22 = vld [vmem:[#allocation2 + $0x94] ss:$12 sps:$4 sm:$0xff]   ;;  %v1360_v25 = vld [vmem:[#allocation2 + $0xac] ss:$12 sps:$4 sm:$0xff]   ;;  %v1363_v27 = vld [vmem:[#allocation2 + $0xb0] ss:$12 sps:$4 sm:$0xff]  }
  0x1c   :  { %291 = vmatprep.subr.bf16.mxu1 %v1340_v10  ;;  %v1362_v26 = vld [vmem:[#allocation2 + $0xa8] ss:$12 sps:$4 sm:$0xff]   ;;  %v1106_v29 = vld [vmem:[%s1722_s2] ss:$0 sm:$0xff]  ;;  %v1366_v36 = vld [vmem:[#allocation2 + $0xc4] ss:$12 sps:$4 sm:$0xff]  }
  0x1d   :  { %1247 = vmatpush3.bf16.msra.mxu0 %v1339_v9  ;;  %v1364_v37 = vld [vmem:[#allocation2 + $0xc0] ss:$12 sps:$4 sm:$0xff]   ;;  %v1367_v38 = vld [vmem:[#allocation2 + $0xc8] ss:$12 sps:$4 sm:$0xff]   ;;  %v1368_v40 = vld [vmem:[#allocation2 + $0xd8] ss:$12 sps:$4 sm:$0xff]  }
  0x1e   :  { %1248 = vmatprep.subr.bf16.mxu0 %v1527_v0  ;;  %v1370_v39 = vld [vmem:[#allocation2 + $0xdc] ss:$12 sps:$4 sm:$0xff]   ;;  %v1371_v41 = vld [vmem:[#allocation2 + $0xe0] ss:$12 sps:$4 sm:$0xff]   ;;  %v1375_v44 = vld [vmem:[#allocation2 + $0xf8] ss:$12 sps:$4 sm:$0xff]  }
  0x1f   :  { %292 = vmatpush1.bf16.msra.mxu1 %v1342_v11  ;;  %v1374_v42 = vld [vmem:[#allocation2 + $0xf4] ss:$12 sps:$4 sm:$0xff]   ;;  %v1372_v43 = vld [vmem:[#allocation2 + $0xf0] ss:$12 sps:$4 sm:$0xff]   ;;  %v1378_v45 = vld [vmem:[#allocation2 + $0x10c] ss:$12 sps:$4 sm:$0xff]  }
  0x20   :  { %293 = vmatprep.subr.bf16.mxu1 %v1344_v13  ;;  %v1376_v46 = vld [vmem:[#allocation2 + $0x108] ss:$12 sps:$4 sm:$0xff]   ;;  %v1379_v47 = vld [vmem:[#allocation2 + $0x110] ss:$12 sps:$4 sm:$0xff]   ;;  %v1380_v49 = vld [vmem:[#allocation2 + $0x120] ss:$12 sps:$4 sm:$0xff]  }
  0x21   :  { %1249 = vmatpush3.bf16.msra.mxu0 %v1343_v12  ;;  %v1382_v48 = vld [vmem:[#allocation2 + $0x124] ss:$12 sps:$4 sm:$0xff]   ;;  %v1383_v50 = vld [vmem:[#allocation2 + $0x128] ss:$12 sps:$4 sm:$0xff]   ;;  %v1387_v53 = vld [vmem:[#allocation2 + $0x140] ss:$12 sps:$4 sm:$0xff]  }
  0x22   :  { %1250 = vmatprep.subr.bf16.mxu0 %v1527_v0  ;;  %v1386_v51 = vld [vmem:[#allocation2 + $0x13c] ss:$12 sps:$4 sm:$0xff]   ;;  %v1384_v52 = vld [vmem:[#allocation2 + $0x138] ss:$12 sps:$4 sm:$0xff]   ;;  %v1390_v54 = vld [vmem:[#allocation2 + $0x154] ss:$12 sps:$4 sm:$0xff]  }
  0x23   :  { %294 = vmatpush1.bf16.msra.mxu1 %v1346_v14  ;;  %v1388_v55 = vld [vmem:[#allocation2 + $0x150] ss:$12 sps:$4 sm:$0xff]   ;;  %v1391_v56 = vld [vmem:[#allocation2 + $0x158] ss:$12 sps:$4 sm:$0xff]   ;;  %v1392_v58 = vld [vmem:[#allocation2 + $0x168] ss:$12 sps:$4 sm:$0xff]  }
  0x24   :  { %295 = vmatprep.subr.bf16.mxu1 %v1348_v16  ;;  %v1394_v57 = vld [vmem:[#allocation2 + $0x16c] ss:$12 sps:$4 sm:$0xff]   ;;  %v1395_v59 = vld [vmem:[#allocation2 + $0x170] ss:$12 sps:$4 sm:$0xff]   ;;  %v145_v61 = vshrl.u32 %v144_v60, 7  ;;  %vm1050_vm2 = vcmask 64512  }
  0x25   :  { %1251 = vmatpush3.bf16.msra.mxu0 %v1347_v15  ;;  %v142_v63 = vld [vmem:[%s1724_s4] sm:$0x7]  ;;  %s1530_s2 = smov [#allocation5]  }
  0x26   :  { %1252 = vmatprep.subr.bf16.mxu0 %v1527_v0  ;;  %v1628_v62 = vsub.s32 0, %v145_v61  ;;  %v1634_v2 = vsub.s32 2, %v145_v61  ;;  %v1637_v15 = vsub.s32 1, %v145_v61  ;;  %s1097_s3 = sshll.u32 %s1530_s2, 4  ;;  %s1098_s3 = int_to_ptr.vmem [resolvable:$true] %s1097_s3 }
  0x27   :  { %296 = vmatpush1.bf16.msra.mxu1 %v1350_v17  ;;  %s1498_s27 = scalar_lea.vmem %s1098_s3, 128  ;;  %p1503_p9 = scmp.lt.s32.totalorder %s1098_s3, %s1098_s3 }
  0x28   :  { %297 = vmatprep.subr.bf16.mxu1 %v1352_v19  ;;  %v147_v1 = vrot.slane %v142_v63, %v1628_v62  ;;  %v155_v6 = vrot.slane %v142_v63, %v1634_v2  ;;  %v151_v17 = vrot.slane %v142_v63, %v1637_v15  ;;  %p1499_p8 = scmp.ne.s32.totalorder %s1098_s3, %s1498_s27  ;;  %p1504_p10 = scmp.lt.s32.totalorder %s1498_s27, %s1498_s27 }
  0x29   :  { %1253 = vmatpush3.bf16.msra.mxu0 %v1351_v18 }
  0x2a   :  { %1254 = vmatprep.subr.bf16.mxu0 %v1527_v0  ;;  %p1505_p11 = por %p1504_p10, %p1503_p9 }
  0x2b   :  { %298 = vmatpush1.bf16.msra.mxu1 %v1354_v20 }
  0x2c   :  { %299 = vmatprep.subr.bf16.mxu1 %v1356_v22  ;;  %p1506_p12 = pnand %p1505_p11, %p1499_p8 }
  0x2d   :  { %1255 = vmatpush3.bf16.msra.mxu0 %v1355_v21 }
  0x2e   :  { %1256 = vmatprep.subr.bf16.mxu0 %v1527_v0 }
  0x2f   :  { %300 = vmatpush1.bf16.msra.mxu1 %v1358_v23 }
  0x30   :  { %301 = vmatprep.subr.bf16.mxu1 %v1360_v25 }
  0x31   :  { %1257 = vmatpush3.bf16.msra.mxu0 %v1359_v24 }
  0x32   :  { %1258 = vmatprep.subr.bf16.mxu0 %v1527_v0 }
  0x33   :  { %302 = vmatpush1.bf16.msra.mxu1 %v1362_v26 }
  0x34   :  { %564 = vmatprep.subr.bf16.mxu1 %v1366_v36  ;;  %v1403_v36 = vld [vmem:[#allocation2 + $0x1a0] ss:$12 sps:$4 sm:$0xff]  }
  0x35   :  { %1259 = vmatpush3.bf16.msra.mxu0 %v1363_v27 }
  0x36   :  { %1264 = vmatprep.subr.bf16.mxu0 %v1527_v0 }
  0xeb   :  { %v103_v30 = vpop.f32.mrb[0].mxu0 }
  0xec   :  { %v104_v31 = vadd.f32 %v1106_v29, %v103_v30  ;;  %v1242_v32 = vpop.f32.mrb[1].mxu0 }
  0xed   :  { %v106_v33 = vpop.f32.mrb[2].mxu0  ;;  %v1396_v32 = vld [vmem:[#allocation2 + $0x180] ss:$12 sps:$4 sm:$0xff]  }
  0xee   :  { %v109_v34 = vpack.c.bf16 %v104_v31, %v104_v31  ;;  %v1243_v35 = vpop.f32.mrb[3].mxu0  ;;  %v1398_v31 = vld [vmem:[#allocation2 + $0x184] ss:$12 sps:$4 sm:$0xff]   ;;  %v1399_v33 = vld [vmem:[#allocation2 + $0x188] ss:$12 sps:$4 sm:$0xff]  }
  0xef   :  { %v1400_v35 = vld [vmem:[#allocation2 + $0x198] ss:$12 sps:$4 sm:$0xff]  }
  0xf0   :  { %320 = vmatmul.mubr.bf16.vlgmr.msra.gmra.mrb[0].mxu1 %v109_v34  ;;  %1261 = vmatmul.mubr.bf16.vlgmr.msra.gmra.mrb[4].mxu0 %v109_v34  ;;  %v1402_v34 = vld [vmem:[#allocation2 + $0x19c] ss:$12 sps:$4 sm:$0xff]  }
  0xf1   :  { %596 = vmatprep.mubr.bf16.mxu1 %v1529_v28  ;;  %1280 = vmatprep.mubr.msk.bf16.mxu0 %vm1528_vm0, %v1527_v0 }
  0xf2   :  { %565 = vmatpush1.bf16.msra.mxu1 %v1364_v37  ;;  %1265 = vmatpush3.bf16.msra.mxu0 %v1367_v38  ;;  %v1406_v37 = vld [vmem:[#allocation2 + $0x1b4] ss:$12 sps:$4 sm:$0xff]   ;;  %v1407_v38 = vld [vmem:[#allocation2 + $0x1b8] ss:$12 sps:$4 sm:$0xff]  }
  0xf3   :  { %1266 = vmatprep.subr.bf16.mxu0 %v1527_v0  ;;  %566 = vmatprep.subr.bf16.mxu1 %v1370_v39  ;;  %v1410_v39 = vld [vmem:[#allocation2 + $0x1cc] ss:$12 sps:$4 sm:$0xff]  }
  0xf6   :  { %567 = vmatpush1.bf16.msra.mxu1 %v1368_v40  ;;  %1267 = vmatpush3.bf16.msra.mxu0 %v1371_v41  ;;  %v1408_v40 = vld [vmem:[#allocation2 + $0x1c8] ss:$12 sps:$4 sm:$0xff]   ;;  %v1411_v41 = vld [vmem:[#allocation2 + $0x1d0] ss:$12 sps:$4 sm:$0xff]  }
  0xf7   :  { %1268 = vmatprep.subr.bf16.mxu0 %v1527_v0  ;;  %568 = vmatprep.subr.bf16.mxu1 %v1374_v42  ;;  %v1414_v42 = vld [vmem:[#allocation2 + $0x1e4] ss:$12 sps:$4 sm:$0xff]  }
  0xfa   :  { %569 = vmatpush1.bf16.msra.mxu1 %v1372_v43  ;;  %1269 = vmatpush3.bf16.msra.mxu0 %v1375_v44  ;;  %v1412_v43 = vld [vmem:[#allocation2 + $0x1e0] ss:$12 sps:$4 sm:$0xff]   ;;  %v1415_v44 = vld [vmem:[#allocation2 + $0x1e8] ss:$12 sps:$4 sm:$0xff]  }
  0xfb   :  { %1270 = vmatprep.subr.bf16.mxu0 %v1527_v0  ;;  %570 = vmatprep.subr.bf16.mxu1 %v1378_v45  ;;  %v1418_v45 = vld [vmem:[#allocation2 + $0x1fc] ss:$12 sps:$4 sm:$0xff]  }
  0xfe   :  { %571 = vmatpush1.bf16.msra.mxu1 %v1376_v46  ;;  %1271 = vmatpush3.bf16.msra.mxu0 %v1379_v47  ;;  %v1416_v46 = vld [vmem:[#allocation2 + $0x1f8] ss:$12 sps:$4 sm:$0xff]   ;;  %v1419_v47 = vld [vmem:[#allocation2 + $0x200] ss:$12 sps:$4 sm:$0xff]  }
  0xff   :  { %1272 = vmatprep.subr.bf16.mxu0 %v1527_v0  ;;  %572 = vmatprep.subr.bf16.mxu1 %v1382_v48  ;;  %v1422_v48 = vld [vmem:[#allocation2 + $0x214] ss:$12 sps:$4 sm:$0xff]  }
 0x102   :  { %573 = vmatpush1.bf16.msra.mxu1 %v1380_v49  ;;  %1273 = vmatpush3.bf16.msra.mxu0 %v1383_v50  ;;  %v1420_v49 = vld [vmem:[#allocation2 + $0x210] ss:$12 sps:$4 sm:$0xff]   ;;  %v1423_v50 = vld [vmem:[#allocation2 + $0x218] ss:$12 sps:$4 sm:$0xff]  }
 0x103   :  { %574 = vmatprep.subr.bf16.mxu1 %v1386_v51  ;;  %1274 = vmatprep.subr.bf16.mxu0 %v1527_v0  ;;  %v1426_v51 = vld [vmem:[#allocation2 + $0x22c] ss:$12 sps:$4 sm:$0xff]  }
 0x106   :  { %575 = vmatpush1.bf16.msra.mxu1 %v1384_v52  ;;  %1275 = vmatpush3.bf16.msra.mxu0 %v1387_v53  ;;  %v1424_v52 = vld [vmem:[#allocation2 + $0x228] ss:$12 sps:$4 sm:$0xff]   ;;  %v1427_v53 = vld [vmem:[#allocation2 + $0x230] ss:$12 sps:$4 sm:$0xff]  }
 0x107   :  { %576 = vmatprep.subr.bf16.mxu1 %v1390_v54  ;;  %1276 = vmatprep.subr.bf16.mxu0 %v1527_v0  ;;  %v1135_v54 = vld [vmem:[%s1724_s4 + $0x3] sm:$0x7] }
 0x10a   :  { %577 = vmatpush1.bf16.msra.mxu1 %v1388_v55  ;;  %1277 = vmatpush3.bf16.msra.mxu0 %v1391_v56  ;;  %v424_v55 = vrot.slane %v1135_v54, %v1628_v62 }
 0x10b   :  { %578 = vmatprep.subr.bf16.mxu1 %v1394_v57  ;;  %1278 = vmatprep.subr.bf16.mxu0 %v1527_v0 }
 0x10e   :  { %579 = vmatpush1.bf16.msra.mxu1 %v1392_v58  ;;  %1279 = vmatpush3.bf16.msra.mxu0 %v1395_v59  ;;  %v432_v59 = vrot.slane %v1135_v54, %v1634_v2 }
 0x10f   :  { %1284 = vmatprep.subr.bf16.mxu0 %v1527_v0  ;;  %841 = vmatprep.subr.bf16.mxu1 %v1398_v31  ;;  %v1162_v31 = vld [vmem:[%s1724_s4 + $0x6] sm:$0x7] }
 0x1c3   :  { %v321_v3 = vpop.f32.mrb[0].mxu1  ;;  %v362_v4 = vpop.f32.mrb[4].mxu0 }
 0x1c4   :  { %v322_v5 = vadd.f32 %v321_v3, %v147_v1  ;;  %v323_v7 = vpop.f32.mrb[1].mxu1  ;;  %v1262_v8 = vpop.f32.mrb[5].mxu0  ;;  %v363_v14 = vadd.f32 %v362_v4, %v155_v6 }
 0x1c5   :  { %v325_v9 = vpop.f32.mrb[2].mxu1  ;;  %v365_v10 = vpop.f32.mrb[6].mxu0  ;;  %v324_v18 = vadd.f32 %v323_v7, %v151_v17  ;;  %v428_v8 = vrot.slane %v1135_v54, %v1637_v15 }
 0x1c6   :  { %v1133_v11 = vmul.f32 -1.442695, %v322_v5  ;;  %v326_v12 = vpop.f32.mrb[3].mxu1  ;;  %v1263_v13 = vpop.f32.mrb[7].mxu0  ;;  %v1134_v16 = vmul.f32 -1.442695, %v363_v14 }
 0x1c8   :  { %1436 = vpow2.f32 %v1133_v11 }
 0x1c9   :  { %1438 = vpow2.f32 %v1134_v16 }
 0x1ca   :  { %1440 = vtanh.f32 %v324_v18 }
 0x1d2   :  { %v1437_v19 = vpop.eup %1436 }
 0x1d3   :  { %v371_v20 = vadd.f32 1.0, %v1437_v19  ;;  %v1439_v21 = vpop.eup %1438 }
 0x1d4   :  { %v378_v22 = vadd.f32 1.0, %v1439_v21  ;;  %v1441_v23 = vpop.eup %1440 }
 0x1d5   :  { %1442 = vrcp.f32 %v371_v20 }
 0x1d6   :  { %1444 = vrcp.f32 %v378_v22  ;;  %v1428_v22 = vld [vmem:[%s1725_s5] sm:$0xff]  }
 0x1df   :  { %v1443_v24 = vpop.eup %1442 }
 0x1e0   :  { %v381_v25 = vmul.f32 %v1443_v24, %v1441_v23  ;;  %v1445_v26 = vpop.eup %1444  ;;  %v1429_v23 = vld [vmem:[%s1725_s5 + $0x8] sm:$0xff]   ;;  %v1430_v24 = vld [vmem:[%s1725_s5 + $0x10] sm:$0xff]  }
 0x1e2   :  { %1446 = vtanh.f32 %v381_v25  ;;  %v1431_v25 = vld [vmem:[%s1725_s5 + $0x18] sm:$0xff]  }
 0x1ec   :  { %v1447_v27 = vpop.eup %1446 }
 0x1ed   :  { %v383_v29 = vmul.f32 %v1447_v27, %v1445_v26  ;;  %v1432_v26 = vld [vmem:[%s1725_s5 + $0x20] sm:$0xff]   ;;  %v1433_v27 = vld [vmem:[%s1725_s5 + $0x28] sm:$0xff]  }
 0x1ef   :  { %v384_v30 = vpack.c.bf16 %v383_v29, %v383_v29  ;;  %v1434_v29 = vld [vmem:[%s1725_s5 + $0x30] sm:$0xff]  }
 0x1f1   :  { %597 = vmatmul.mubr.bf16.vlgmr.msra.gmra.mrb[4].mxu1 %v384_v30  ;;  %1281 = vmatmul.mubr.bf16.vlgmr.msra.gmra.mrb[8].mxu0 %v384_v30  ;;  %v1435_v30 = vld [vmem:[%s1725_s5 + $0x38] sm:$0xff]  }
 0x1f2   :  { %873 = vmatprep.mubr.bf16.mxu1 %v1529_v28  ;;  %1300 = vmatprep.mubr.msk.bf16.mxu0 %vm1528_vm0, %v1527_v0  ;;  %v1404_v28 = vld [vmem:[#allocation2 + $0x1b0] ss:$12 sps:$4 sm:$0xff]  }
 0x1f3   :  { %842 = vmatpush1.bf16.msra.mxu1 %v1396_v32  ;;  %1285 = vmatpush3.bf16.msra.mxu0 %v1399_v33  ;;  %v701_v32 = vrot.slane %v1162_v31, %v1628_v62 }
 0x1f4   :  { %1286 = vmatprep.subr.bf16.mxu0 %v1527_v0  ;;  %843 = vmatprep.subr.bf16.mxu1 %v1402_v34 }
 0x1f7   :  { %844 = vmatpush1.bf16.msra.mxu1 %v1400_v35  ;;  %1287 = vmatpush3.bf16.msra.mxu0 %v1403_v36  ;;  %v709_v36 = vrot.slane %v1162_v31, %v1634_v2 }
 0x1f8   :  { %1288 = vmatprep.subr.bf16.mxu0 %v1527_v0  ;;  %845 = vmatprep.subr.bf16.mxu1 %v1406_v37 }
 0x1fb   :  { %846 = vmatpush1.bf16.msra.mxu1 %v1404_v28  ;;  %1289 = vmatpush3.bf16.msra.mxu0 %v1407_v38 }
 0x1fc   :  { %1290 = vmatprep.subr.bf16.mxu0 %v1527_v0  ;;  %847 = vmatprep.subr.bf16.mxu1 %v1410_v39 }
 0x1ff   :  { %848 = vmatpush1.bf16.msra.mxu1 %v1408_v40  ;;  %1291 = vmatpush3.bf16.msra.mxu0 %v1411_v41 }
 0x200   :  { %1292 = vmatprep.subr.bf16.mxu0 %v1527_v0  ;;  %849 = vmatprep.subr.bf16.mxu1 %v1414_v42 }
 0x203   :  { %850 = vmatpush1.bf16.msra.mxu1 %v1412_v43  ;;  %1293 = vmatpush3.bf16.msra.mxu0 %v1415_v44  ;;  %v705_v44 = vrot.slane %v1162_v31, %v1637_v15  ;;  %v1189_v15 = vld [vmem:[%s1726_s6] ss:$0 sm:$0xff] }
 0x204   :  { %851 = vmatprep.subr.bf16.mxu1 %v1418_v45  ;;  %1294 = vmatprep.subr.bf16.mxu0 %v1527_v0 }
 0x207   :  { %852 = vmatpush1.bf16.msra.mxu1 %v1416_v46  ;;  %1295 = vmatpush3.bf16.msra.mxu0 %v1419_v47 }
 0x208   :  { %853 = vmatprep.subr.bf16.mxu1 %v1422_v48  ;;  %1296 = vmatprep.subr.bf16.mxu0 %v1527_v0 }
 0x20b   :  { %854 = vmatpush1.bf16.msra.mxu1 %v1420_v49  ;;  %1297 = vmatpush3.bf16.msra.mxu0 %v1423_v50 }
 0x20c   :  { %855 = vmatprep.subr.bf16.mxu1 %v1426_v51  ;;  %1298 = vmatprep.subr.bf16.mxu0 %v1527_v0 }
 0x20f   :  { %856 = vmatpush1.bf16.msra.mxu1 %v1424_v52  ;;  %1299 = vmatpush3.bf16.msra.mxu0 %v1427_v53 }
 0x210   :  { %1304 = vmatprep.subr.bf16.mxu1 %v1527_v0 }
 0x2c4   :  { %v598_v56 = vpop.f32.mrb[4].mxu1  ;;  %v639_v57 = vpop.f32.mrb[8].mxu0 }
 0x2c5   :  { %v599_v58 = vadd.f32 %v598_v56, %v424_v55  ;;  %v600_v60 = vpop.f32.mrb[5].mxu1  ;;  %v1282_v61 = vpop.f32.mrb[9].mxu0  ;;  %v640_v6 = vadd.f32 %v639_v57, %v432_v59 }
 0x2c6   :  { %v602_v63 = vpop.f32.mrb[6].mxu1  ;;  %v642_v1 = vpop.f32.mrb[10].mxu0  ;;  %v601_v9 = vadd.f32 %v600_v60, %v428_v8 }
 0x2c7   :  { %v1160_v3 = vmul.f32 -1.442695, %v599_v58  ;;  %v603_v4 = vpop.f32.mrb[7].mxu1  ;;  %v1283_v5 = vpop.f32.mrb[11].mxu0  ;;  %v1161_v7 = vmul.f32 -1.442695, %v640_v6 }
 0x2c9   :  { %1448 = vpow2.f32 %v1160_v3 }
 0x2ca   :  { %1450 = vpow2.f32 %v1161_v7 }
 0x2cb   :  { %1452 = vtanh.f32 %v601_v9 }
 0x2d3   :  { %v1449_v10 = vpop.eup %1448 }
 0x2d4   :  { %v648_v11 = vadd.f32 1.0, %v1449_v10  ;;  %v1451_v12 = vpop.eup %1450 }
 0x2d5   :  { %v655_v13 = vadd.f32 1.0, %v1451_v12  ;;  %v1453_v14 = vpop.eup %1452 }
 0x2d6   :  { %1454 = vrcp.f32 %v648_v11 }
 0x2d7   :  { %1456 = vrcp.f32 %v655_v13 }
 0x2e0   :  { %v1455_v16 = vpop.eup %1454 }
 0x2e1   :  { %v658_v17 = vmul.f32 %v1455_v16, %v1453_v14  ;;  %v1457_v18 = vpop.eup %1456 }
 0x2e3   :  { %1458 = vtanh.f32 %v658_v17 }
 0x2ed   :  { %v1459_v19 = vpop.eup %1458 }
 0x2ee   :  { %v660_v20 = vmul.f32 %v1459_v19, %v1457_v18 }
 0x2f0   :  { %v661_v21 = vpack.c.bf16 %v660_v20, %v660_v20  ;;  %v1198_v20 = vld [vmem:[%s1727_s7] ss:$0 sm:$0xff] }
 0x2f2   :  { %874 = vmatmul.mubr.bf16.vlgmr.msra.gmra.mrb[8].mxu1 %v661_v21  ;;  %1301 = vmatmul.mubr.bf16.vlgmr.msra.gmra.mrb[12].mxu0 %v661_v21 }
 0x2f3   :  { %1320 = vmatprep.mubr.msk.bf16.mxu1 %vm1528_vm0, %v1527_v0  ;;  %1305 = vmatpush3.bf16.msra.mxu1 %v1428_v22  ;;  %v1199_v22 = vld [vmem:[%s1728_s8] ss:$0 sm:$0xff] }
 0x2f4   :  { %1306 = vmatprep.subr.bf16.mxu1 %v1527_v0 }
 0x2f7   :  { %1307 = vmatpush3.bf16.msra.mxu1 %v1429_v23 }
 0x2f8   :  { %1308 = vmatprep.subr.bf16.mxu1 %v1527_v0 }
 0x2fb   :  { %1309 = vmatpush3.bf16.msra.mxu1 %v1430_v24 }
 0x2fc   :  { %1310 = vmatprep.subr.bf16.mxu1 %v1527_v0 }
 0x2ff   :  { %1311 = vmatpush3.bf16.msra.mxu1 %v1431_v25 }
 0x300   :  { %1312 = vmatprep.subr.bf16.mxu1 %v1527_v0 }
 0x303   :  { %1313 = vmatpush3.bf16.msra.mxu1 %v1432_v26 }
 0x304   :  { %1314 = vmatprep.subr.bf16.mxu1 %v1527_v0 }
 0x307   :  { %1315 = vmatpush3.bf16.msra.mxu1 %v1433_v27 }
 0x308   :  { %1316 = vmatprep.subr.bf16.mxu1 %v1527_v0 }
 0x30b   :  { %1317 = vmatpush3.bf16.msra.mxu1 %v1434_v29 }
 0x30c   :  { %1318 = vmatprep.subr.bf16.mxu1 %v1527_v0 }
 0x30f   :  { %1319 = vmatpush3.bf16.msra.mxu1 %v1435_v30 }
 0x3c5   :  { %v875_v33 = vpop.f32.mrb[8].mxu1  ;;  %v916_v34 = vpop.f32.mrb[12].mxu0 }
 0x3c6   :  { %v876_v35 = vadd.f32 %v875_v33, %v701_v32  ;;  %v877_v37 = vpop.f32.mrb[9].mxu1  ;;  %v1302_v28 = vpop.f32.mrb[13].mxu0  ;;  %v917_v0 = vadd.f32 %v916_v34, %v709_v36 }
 0x3c7   :  { %v879_v38 = vpop.f32.mrb[10].mxu1  ;;  %v919_v39 = vpop.f32.mrb[14].mxu0  ;;  %v878_v45 = vadd.f32 %v877_v37, %v705_v44 }
 0x3c8   :  { %v1187_v40 = vmul.f32 -1.442695, %v876_v35  ;;  %v880_v41 = vpop.f32.mrb[11].mxu1  ;;  %v1303_v42 = vpop.f32.mrb[15].mxu0  ;;  %v1188_v43 = vmul.f32 -1.442695, %v917_v0 }
 0x3ca   :  { %1460 = vpow2.f32 %v1187_v40 }
 0x3cb   :  { %1462 = vpow2.f32 %v1188_v43 }
 0x3cc   :  { %1464 = vtanh.f32 %v878_v45 }
 0x3d4   :  { %v1461_v62 = vpop.eup %1460 }
 0x3d5   :  { %v925_v46 = vadd.f32 1.0, %v1461_v62  ;;  %v1463_v47 = vpop.eup %1462 }
 0x3d6   :  { %v932_v2 = vadd.f32 1.0, %v1463_v47  ;;  %v1465_v48 = vpop.eup %1464 }
 0x3d7   :  { %1466 = vrcp.f32 %v925_v46 }
 0x3d8   :  { %1468 = vrcp.f32 %v932_v2 }
 0x3e1   :  { %v1467_v49 = vpop.eup %1466 }
 0x3e2   :  { %v935_v50 = vmul.f32 %v1467_v49, %v1465_v48  ;;  %v1469_v51 = vpop.eup %1468 }
 0x3e4   :  { %1470 = vtanh.f32 %v935_v50 }
 0x3ee   :  { %v1471_v52 = vpop.eup %1470 }
 0x3ef   :  { %v937_v53 = vmul.f32 %v1471_v52, %v1469_v51 }
 0x3f1   :  { %v938_v54 = vpack.c.bf16 %v937_v53, %v937_v53 }
 0x3f3   :  { %1321 = vmatmul.mubr.bf16.vlgmr.msra.gmra.mrb[12].mxu1 %v938_v54 }
 0x4c6   :  { %v1044_v55 = vpop.f32.mrb[12].mxu1 }
 0x4c7   :  { %v1045_v56 = vadd.f32 %v1189_v15, %v1044_v55  ;;  %v1322_v57 = vpop.f32.mrb[13].mxu1 }
 0x4c8   :  { %v1047_v58 = vpop.f32.mrb[14].mxu1 }
 0x4c9   :  { %v1051_v59 = vsel %vm1050_vm2, %v1045_v56, 0.0  ;;  %v1323_v60 = vpop.f32.mrb[15].mxu1 }
 0x4ca   :  { %v1052_v61 = vrot.slane %v1051_v59, 4 }
 0x4cc   :  { %v1053_v63 = vadd.f32 %v1052_v61, %v1051_v59 }
 0x4ce   :  { %v1054_v1 = vrot.slane %v1053_v63, 2 }
 0x4d0   :  { %v1055_v3 = vadd.f32 %v1054_v1, %v1053_v63 }
 0x4d2   :  { %v1056_v4 = vrot.slane %v1055_v3, 1 }
 0x4d4   :  { %v1057_v5 = vadd.f32 %v1056_v4, %v1055_v3 }
 0x4d6   :  { %v1059_v6 = vmul.f32 0.125, %v1057_v5 }
 0x4d8   :  { %v1060_v7 = vsub.f32 %v1045_v56, %v1059_v6 }
 0x4da   :  { %v1061_v8 = vmul.f32 %v1060_v7, %v1060_v7 }
 0x4dc   :  { %v1062_v9 = vsel %vm1050_vm2, %v1061_v8, 0.0 }
 0x4dd   :  { %v1063_v10 = vrot.slane %v1062_v9, 4 }
 0x4df   :  { %v1064_v11 = vadd.f32 %v1063_v10, %v1062_v9 }
 0x4e1   :  { %v1065_v12 = vrot.slane %v1064_v11, 2 }
 0x4e3   :  { %v1066_v13 = vadd.f32 %v1065_v12, %v1064_v11 }
 0x4e5   :  { %v1067_v14 = vrot.slane %v1066_v13, 1 }
 0x4e7   :  { %v1068_v16 = vadd.f32 %v1067_v14, %v1066_v13 }
 0x4e9   :  { %v1069_v17 = vmul.f32 0.125, %v1068_v16 }
 0x4eb   :  { %v1070_v18 = vadd.f32 1e-05, %v1069_v17 }
 0x4ed   :  { %1472 = vrsqrt.f32 %v1070_v18 }
 0x4f7   :  { %v1473_v19 = vpop.eup %1472 }
 0x4f8   :  { %v1072_v21 = vmul.f32 %v1473_v19, %v1060_v7 }
 0x4fa   :  { %v1080_v23 = vmul.f32 %v1198_v20, %v1072_v21 }
 0x4fc   :  { %v1088_v24 = vadd.f32 %v1199_v22, %v1080_v23 }
 0x4fe   :  { %1474 = vtanh.f32 %v1088_v24 }
 0x508   :  { %v1475_v25 = vpop.eup %1474 }
 0x509   :  { %1090 = vst.msk [vmem:[#allocation5] sm:$0xff] %vm1050_vm2, %v1475_v25 }
 0x50a   :  { %1509 = shalt.err (!%p1506_p12)
}
 0x50b   :  { %s1510_s8 = scalar_lea.hbm %s1729_s9, 128 }
 0x50c   :  { %p1511_p13 = scmp.ne.s32.totalorder %s1729_s9, %s1510_s8  ;;  %p1514_p0 = scmp.lt.u32.totalorder %s1510_s8, %s1729_s9 }
 0x50e   :  { %p1516_p1 = pnand %p1514_p0, %p1511_p13 }
 0x510   :  { %1519 = shalt.err (!%p1516_p1)
}
 0x511   :  { %1100 = dma.vmem_to_hbm [thread:$0]  %s1098_s3, 128, %s1729_s9, [#allocation4]  }
 0x512   :  { %1522 = dma.done.wait [#allocation4], 128  }
 0x513   :  { %1523 = vsyncadd [#allocation4], 4294967168 }
 0x514   :  { %1104 = vsyncpa [#allocation3], 1 }
 0x515   :  { %1105 = vsyncpa [#allocation4], 1 }

</bundles_post_ra>
